<compile_context>
chip_gen: v5e
topology: v5e:2x2
jax: 0.10.0
libtpu: 0.0.40
codegen_flags: <defaults>
</compile_context>

<pallas_src>
import jax
import jax.numpy as jnp
from jax.experimental import pallas as pl
from jax.experimental.pallas import tpu as pltpu


# ---------------------------------------------------------------------------
# VMEM budgeting (per-generation, derived from physical VMEM).
# ---------------------------------------------------------------------------
def _vmem_limit_bytes():
    try:
        phys = int(pltpu.get_tpu_info().vmem_capacity_bytes)
    except Exception:
        phys = 64 << 20                      # conservative (v7x per-TC) fallback
    # Leave headroom below physical VMEM; cap so v5e/v6e don't over-commit.
    return int(min((phys * 3) // 4, 96 << 20))


_VMEM_LIMIT = _vmem_limit_bytes()
# Fused path double-buffers 1 input + 2 outputs (6 buffers) plus f32
# intermediates: ~1/12 of the limit per block keeps ~2x headroom.
# => ~8 MiB blocks on v5e/v6e, ~4 MiB on v7x.
_BLOCK_BUDGET = max(2 << 20, _VMEM_LIMIT // 12)


# ---------------------------------------------------------------------------
# Kernels.  Blocks are either (1, C, T) or (1, C, S, 128); the channel axis is
# always axis=1, so the same reduction code covers both layouts.
# ---------------------------------------------------------------------------
def _softmax_kernel(x_ref, o_ref):
    x = x_ref[...].astype(jnp.float32)
    m = jnp.max(x, axis=1, keepdims=True)
    e = jnp.exp(x - m)
    s = jnp.sum(e, axis=1, keepdims=True)
    o_ref[...] = (e / s).astype(o_ref.dtype)


def _sigmoid_kernel(x_ref, o_ref):
    x = x_ref[...].astype(jnp.float32)
    o_ref[...] = (1.0 / (1.0 + jnp.exp(-x))).astype(o_ref.dtype)


def _fused_kernel(x_ref, sm_ref, sg_ref):
    x = x_ref[...].astype(jnp.float32)
    m = jnp.max(x, axis=1, keepdims=True)
    e = jnp.exp(x - m)
    s = jnp.sum(e, axis=1, keepdims=True)
    sm_ref[...] = (e / s).astype(sm_ref.dtype)
    sg_ref[...] = (1.0 / (1.0 + jnp.exp(-x))).astype(sg_ref.dtype)


# ---------------------------------------------------------------------------
# Trace-time tiling plan.
# ---------------------------------------------------------------------------
def _plan(n, c, hw):
    """Lane-dense, VMEM-budgeted layout/tiling.

    Returns (view_shape, block_shape, grid, index_map).  All arithmetic is on
    static Python ints (runs at trace time)."""
    budget_elems = max(128, _BLOCK_BUDGET // (4 * c))   # f32 elems per channel/block
    if hw % 128 == 0:
        # Fully-packed layout: lanes=128, sublanes=spatial, channels as planes.
        s_total = hw // 128
        s_tile = max(8, (budget_elems // 128) // 8 * 8)
        if s_tile >= s_total:
            s_tile = s_total                  # full-dim block — always legal
        view = (n, c, s_total, 128)
        block = (1, c, s_tile, 128)
        grid = (n, pl.cdiv(s_total, s_tile))
        index_map = lambda i, j: (i, 0, j, 0)
    else:
        # Generic layout: channels on the sublane axis, H*W on the lane axis.
        tile = max(128, (budget_elems // 128) * 128)
        if tile >= hw:
            tile = hw                         # full-dim block — always legal
        view = (n, c, hw)
        block = (1, c, tile)
        grid = (n, pl.cdiv(hw, tile))
        index_map = lambda i, j: (i, 0, j)
    return view, block, grid, index_map


def _run(kernel, x_nchw, num_outputs):
    n, c, h, w = x_nchw.shape
    hw = h * w
    view, block, grid, index_map = _plan(n, c, hw)
    x_v = x_nchw.reshape(view)                # free reshape (row-major, no transpose)
    spec = pl.BlockSpec(block, index_map)
    one_out = jax.ShapeDtypeStruct(view, x_nchw.dtype)
    outs = pl.pallas_call(
        kernel,
        out_shape=one_out if num_outputs == 1 else (one_out,) * num_outputs,
        grid=grid,
        in_specs=[spec],
        out_specs=spec if num_outputs == 1 else (spec,) * num_outputs,
        compiler_params=pltpu.CompilerParams(
            dimension_semantics=("parallel", "parallel"),
            vmem_limit_bytes=_VMEM_LIMIT),
    )(x_v)
    if num_outputs == 1:
        return outs.reshape(n, c, h, w)
    return tuple(o.reshape(n, c, h, w) for o in outs)


# ---------------------------------------------------------------------------
# Public wrappers.
# ---------------------------------------------------------------------------
@jax.jit
def fused_softmax_sigmoid(x_nchw):
    """Softmax(dim=1) and sigmoid of an NCHW tensor in a single HBM pass."""
    return _run(_fused_kernel, x_nchw, 2)


@jax.jit
def softmax_dim1(x_nchw):
    """nn.Softmax(dim=1) on an NCHW tensor (dedicated single-output kernel)."""
    return _run(_softmax_kernel, x_nchw, 1)


@jax.jit
def sigmoid(x_nchw):
    """nn.Sigmoid() on an NCHW tensor (dedicated single-output kernel)."""
    return _run(_sigmoid_kernel, x_nchw, 1)


class BasicModulePallas:
    """Mirror of BasicModule: holds the activation dict; forward delegates to
    self.model, which the base class never defines (subclasses supply it)."""

    def __init__(self):
        self.act = {"softmax": softmax_dim1, "sigmoid": sigmoid}
        self.model = None  # TODO(synk): subclasses of BasicModule supply self.model.

    # TODO(synk): data_parallel/load/save wrap nn.DataParallel / torch IO and
    # have no Pallas equivalent — omitted.

    def forward(self, x, y):
        if self.model is None:
            # The base class owns only the activations; y is unused here.
            return fused_softmax_sigmoid(x)
        return self.model(x, y)


# ---------------------------------------------------------------------------
# Main
# ---------------------------------------------------------------------------
if __name__ == "__main__":
    key = jax.random.PRNGKey(0)
    kx, ky = jax.random.split(key)
    # Small NCHW shapes consistent with an SE-ResNet style input.
    x = jax.random.normal(kx, (2, 4, 16, 16), dtype=jnp.float32)   # H*W % 128 == 0 path
    y = jax.random.normal(ky, (2, 4, 16, 16), dtype=jnp.float32)   # unused by base class

    mod = BasicModulePallas()
    sm, sg = mod.forward(x, y)
    sm = jax.block_until_ready(sm)
    sg = jax.block_until_ready(sg)
    assert jnp.allclose(sm, jax.nn.softmax(x, axis=1), atol=1e-5, rtol=1e-5), "softmax mismatch"
    assert jnp.allclose(sg, jax.nn.sigmoid(x), atol=1e-5, rtol=1e-5), "sigmoid mismatch"

    # Single-output wrappers (the act dict) + the generic layout path
    # (H*W = 49, not a multiple of 128).
    x2 = jax.random.normal(ky, (2, 8, 7, 7), dtype=jnp.float32)
    sm2 = jax.block_until_ready(mod.act["softmax"](x2))
    sg2 = jax.block_until_ready(mod.act["sigmoid"](x2))
    assert jnp.allclose(sm2, jax.nn.softmax(x2, axis=1), atol=1e-5, rtol=1e-5), "softmax(7x7) mismatch"
    assert jnp.allclose(sg2, jax.nn.sigmoid(x2), atol=1e-5, rtol=1e-5), "sigmoid(7x7) mismatch"

    print("KERNEL_OK")
</pallas_src>

<mosaic_0001>
module attributes {stable_mosaic.version = 11 : i64} {
  func.func @_fused_kernel(%arg0: i32, %arg1: i32, %arg2: memref<1x4x2x128xf32, #tpu.memory_space<vmem>>, %arg3: memref<1x4x2x128xf32, #tpu.memory_space<vmem>>, %arg4: memref<1x4x2x128xf32, #tpu.memory_space<vmem>>) attributes {dimension_semantics = [#tpu.dimension_semantics<parallel>, #tpu.dimension_semantics<parallel>], iteration_bounds = array<i64: 2, 1>, scalar_prefetch = 0 : i64, scratch_operands = 0 : i64, tpu.core_type = #tpu.core_type<tc>, window_params = [{transform_indices = @transform_0, window_bounds = array<i64: 1, 4, 2, 128>}, {transform_indices = @transform_1, window_bounds = array<i64: 1, 4, 2, 128>}, {transform_indices = @transform_2, window_bounds = array<i64: 1, 4, 2, 128>}]} {
    %c0 = arith.constant 0 : index
    %c0_0 = arith.constant 0 : index
    %c0_1 = arith.constant 0 : index
    %c0_2 = arith.constant 0 : index
    %0 = vector.load %arg2[%c0, %c0_0, %c0_1, %c0_2] : memref<1x4x2x128xf32, #tpu.memory_space<vmem>>, vector<1x4x2x128xf32>
    %cst = arith.constant dense<0xFF800000> : vector<1x2x128xf32>
    %1 = vector.multi_reduction <maximumf>, %0, %cst [1] : vector<1x4x2x128xf32> to vector<1x2x128xf32>
    %2 = vector.shape_cast %1 : vector<1x2x128xf32> to vector<1x1x2x128xf32>
    %3 = vector.broadcast %2 : vector<1x1x2x128xf32> to vector<1x4x2x128xf32>
    %4 = arith.subf %0, %3 : vector<1x4x2x128xf32>
    %5 = math.exp %4 : vector<1x4x2x128xf32>
    %cst_3 = arith.constant dense<0.000000e+00> : vector<1x2x128xf32>
    %6 = vector.multi_reduction <add>, %5, %cst_3 [1] : vector<1x4x2x128xf32> to vector<1x2x128xf32>
    %7 = vector.shape_cast %6 : vector<1x2x128xf32> to vector<1x1x2x128xf32>
    %8 = vector.broadcast %7 : vector<1x1x2x128xf32> to vector<1x4x2x128xf32>
    %9 = arith.divf %5, %8 : vector<1x4x2x128xf32>
    %c0_4 = arith.constant 0 : index
    %c0_5 = arith.constant 0 : index
    %c0_6 = arith.constant 0 : index
    %c0_7 = arith.constant 0 : index
    %10 = vector.load %arg3[%c0_4, %c0_5, %c0_6, %c0_7] : memref<1x4x2x128xf32, #tpu.memory_space<vmem>>, vector<1x4x2x128xf32>
    tpu.vector_store %arg3[%c0_4, %c0_5, %c0_6, %c0_7], %9 {strides = array<i32>} : memref<1x4x2x128xf32, #tpu.memory_space<vmem>>, vector<1x4x2x128xf32>,
    %cst_8 = arith.constant 0.000000e+00 : f32
    %11 = vector.broadcast %cst_8 : f32 to vector<1x4x2x128xf32>
    %12 = arith.subf %11, %0 : vector<1x4x2x128xf32>
    %13 = math.exp %12 : vector<1x4x2x128xf32>
    %cst_9 = arith.constant 1.000000e+00 : f32
    %14 = vector.broadcast %cst_9 : f32 to vector<1x4x2x128xf32>
    %15 = arith.addf %14, %13 : vector<1x4x2x128xf32>
    %cst_10 = arith.constant 1.000000e+00 : f32
    %16 = vector.broadcast %cst_10 : f32 to vector<1x4x2x128xf32>
    %17 = arith.divf %16, %15 : vector<1x4x2x128xf32>
    %c0_11 = arith.constant 0 : index
    %c0_12 = arith.constant 0 : index
    %c0_13 = arith.constant 0 : index
    %c0_14 = arith.constant 0 : index
    %18 = vector.load %arg4[%c0_11, %c0_12, %c0_13, %c0_14] : memref<1x4x2x128xf32, #tpu.memory_space<vmem>>, vector<1x4x2x128xf32>
    tpu.vector_store %arg4[%c0_11, %c0_12, %c0_13, %c0_14], %17 {strides = array<i32>} : memref<1x4x2x128xf32, #tpu.memory_space<vmem>>, vector<1x4x2x128xf32>,
    return
  }
  func.func @transform_0(%arg0: i32, %arg1: i32) -> (i32, i32, i32, i32) {
    %c0_i32 = arith.constant 0 : i32
    %c0_i32_0 = arith.constant 0 : i32
    %c0_i32_1 = arith.constant 0 : i32
    return %arg0, %c0_i32, %arg1, %c0_i32_0 : i32, i32, i32, i32
  }
  func.func @transform_1(%arg0: i32, %arg1: i32) -> (i32, i32, i32, i32) {
    %c0_i32 = arith.constant 0 : i32
    %c0_i32_0 = arith.constant 0 : i32
    %c0_i32_1 = arith.constant 0 : i32
    return %arg0, %c0_i32, %arg1, %c0_i32_0 : i32, i32, i32, i32
  }
  func.func @transform_2(%arg0: i32, %arg1: i32) -> (i32, i32, i32, i32) {
    %c0_i32 = arith.constant 0 : i32
    %c0_i32_0 = arith.constant 0 : i32
    %c0_i32_1 = arith.constant 0 : i32
    return %arg0, %c0_i32, %arg1, %c0_i32_0 : i32, i32, i32, i32
  }
}

</mosaic_0001>

<bundles_post_ra>
// kernel: fused_softmax_sigmoid.1
= control target key start
LH: loop header
LB: loop body
LE: loop exit
PB: predicated region body
PF: predicated region fallthrough
CT: control target
= control target key end

     0   :  { %s564_s9 = smov 0   ;;  %s566_s10 = smov 0   ;;  %s685_s0 = inlined_call_operand.vmem [shape: f32[2,4,2,128], index: 0, kind: input, shape index: {}]   ;;  %s686_s1 = inlined_call_operand.vmem [shape: f32[2,4,2,128], index: 1, kind: output, shape index: {0}]   ;;  %s687_s2 = inlined_call_operand.vmem [shape: f32[2,4,2,128], index: 2, kind: output, shape index: {1}]  }
   0x1   :  { %s568_s11 = smov 0  }
   0x2 LB: > { %s25_s12 = sadd.s32 1, %s543_s10  ;;  %p463_p0 = scmp.ge.s32.totalorder %s547_s11, 1  ;;  %s547_s11 = sphi %s568_s11, %s13_s11   ;;  %s543_s10 = sphi %s566_s10, %s703_s10   ;;  %s539_s9 = sphi %s564_s9, %s702_s9  }
   0x3   : > { %p27_p1 = scmp.ge.s32.totalorder %s25_s12, 2  ;;  %p136_p2 = scmp.lt.s32.totalorder %s547_s11, 3 }
   0x5   : > { %s705_s12 = smov (%p27_p1, %s25_s12), 0  ;;  %p137_p3 = pnand %p463_p0, %p136_p2 }
   0x6   : > { %p172_p4 = scmp.lt.s32.totalorder (!%p137_p3), %s539_s9, 1 }
   0x7   : > { %140 = sbr.rel (%p137_p3) target bundleno = 64 (0x40), region = 24 }
   0xc   : > { %s707_s9 = smov (!%p172_p4, %s539_s9), 1  ;;  %vm200_vm0 = vcmask 1041408  }
   0xd   : > { %s582_s13 = sshll.u32 %s707_s9, 3 }
   0xe   : > { %s179_s16 = scalar_lea.vmem %s685_s0, %s582_s13  ;;  %s195_s19 = scalar_lea.vmem %s687_s2, %s582_s13 }
   0xf   : > { %v196_v0 = vld [vmem:[%s179_s16] sm:$0x3]  ;;  %v197_v1 = vld [vmem:[%s179_s16 + $0x2] sm:$0x3]  ;;  %v198_v2 = vld [vmem:[%s179_s16 + $0x4] sm:$0x3]  ;;  %s187_s22 = scalar_lea.vmem %s686_s1, %s582_s13 }
  0x10   : > { %v199_v3 = vld [vmem:[%s179_s16 + $0x6] sm:$0x3]  ;;  %v201_v4 = vsel %vm200_vm0, %v196_v0, -inf  ;;  %v202_v5 = vsel %vm200_vm0, %v197_v1, -inf  ;;  %v203_v6 = vsel %vm200_vm0, %v198_v2, -inf  ;;  %v249_v7 = vsub.f32 0.0, %v196_v0 }
  0x11   : > { %v204_v8 = vsel %vm200_vm0, %v199_v3, -inf  ;;  %v205_v9 = vmax.f32 %v201_v4, %v202_v5  ;;  %v250_v10 = vsub.f32 0.0, %v197_v1  ;;  %v251_v11 = vsub.f32 0.0, %v198_v2 }
  0x12   : > { %v206_v12 = vmax.f32 %v203_v6, %v204_v8  ;;  %v252_v13 = vsub.f32 0.0, %v199_v3  ;;  %v253_v14 = vmul.f32 1.442695, %v249_v7 }
  0x13   : > { %v255_v15 = vmul.f32 1.442695, %v250_v10  ;;  %v257_v16 = vmul.f32 1.442695, %v251_v11 }
  0x14   : > { %v207_v17 = vmax.f32 %v205_v9, %v206_v12  ;;  %499 = vpow2.f32 %v253_v14  ;;  %v259_v18 = vmul.f32 1.442695, %v252_v13 }
  0x15   : > { %501 = vpow2.f32 %v255_v15 }
  0x16   : > { %v208_v19 = vsub.f32 %v196_v0, %v207_v17  ;;  %v209_v20 = vsub.f32 %v197_v1, %v207_v17  ;;  %v210_v21 = vsub.f32 %v198_v2, %v207_v17  ;;  %v211_v22 = vsub.f32 %v199_v3, %v207_v17 }
  0x17   : > { %503 = vpow2.f32 %v257_v16 }
  0x18   : > { %v212_v23 = vmul.f32 1.442695, %v208_v19  ;;  %v214_v24 = vmul.f32 1.442695, %v209_v20  ;;  %v216_v25 = vmul.f32 1.442695, %v210_v21  ;;  %505 = vpow2.f32 %v259_v18 }
  0x19   : > { %v218_v26 = vmul.f32 1.442695, %v211_v22 }
  0x1a   : > { %v500_v27 = vpop.eup %499  ;;  %507 = vpow2.f32 %v212_v23 }
  0x1b   : > { %v502_v28 = vpop.eup %501  ;;  %509 = vpow2.f32 %v214_v24  ;;  %v261_v29 = vadd.f32 1.0, %v500_v27 }
  0x1c   : > { %511 = vpow2.f32 %v216_v25  ;;  %v262_v30 = vadd.f32 1.0, %v502_v28 }
  0x1d   : > { %v504_v31 = vpop.eup %503  ;;  %513 = vpow2.f32 %v218_v26  ;;  %v274_v38 = vand.u32 2147483647, %v261_v29  ;;  %v276_v41 = vand.u32 2147483648, %v261_v29  ;;  %vm270_vm1 = vweird.f32 %v261_v29 }
  0x1e   : > { %v506_v32 = vpop.eup %505  ;;  %515 = vrcp.f32 %v261_v29  ;;  %v263_v33 = vadd.f32 1.0, %v504_v31  ;;  %v289_v42 = vand.u32 2147483647, %v262_v30  ;;  %v291_v46 = vand.u32 2147483648, %v262_v30 }
  0x1f   : > { %517 = vrcp.f32 %v262_v30  ;;  %v594_v35 = vadd.f32 1.0, %v506_v32  ;;  %vm285_vm2 = vweird.f32 %v262_v30  ;;  %vm611_vm3 = vcmp.eq.f32.partialorder %v274_v38, 8.507059e+37 }
  0x20   : > { %v592_v34 = vpop.eup %507  ;;  %519 = vrcp.f32 %v263_v33  ;;  %v277_v53 = vor.u32 1.1754944e-38, %v276_v41  ;;  %vm615_vm4 = vcmp.eq.f32.partialorder %v289_v42, 8.507059e+37  ;;  %v292_v59 = vor.u32 1.1754944e-38, %v291_v46 }
  0x21   : > { %v596_v36 = vpop.eup %509  ;;  %v220_v37 = vsel %vm200_vm0, %v592_v34, 0.0  ;;  %521 = vrcp.f32 %v594_v35  ;;  %vm300_vm7 = vweird.f32 %v263_v33  ;;  %v304_v63 = vand.u32 2147483647, %v263_v33 }
  0x22   : > { %v600_v39 = vpop.eup %511  ;;  %v221_v40 = vsel %vm200_vm0, %v596_v36, 0.0  ;;  %v306_v0 = vand.u32 2147483648, %v263_v33  ;;  %vm315_vm11 = vweird.f32 %v594_v35  ;;  %v319_v7 = vand.u32 2147483647, %v594_v35 }
  0x23   : > { %v605_v43 = vpop.eup %513  ;;  %v222_v44 = vadd.f32 %v221_v40, %v220_v37  ;;  %v223_v45 = vsel %vm200_vm0, %v600_v39, 0.0  ;;  %v321_v8 = vand.u32 2147483648, %v594_v35  ;;  %vm643_vm14 = vcmp.eq.f32.partialorder %v304_v63, 8.507059e+37 }
  0x24   : > { %v516_v47 = vpop.eup %515  ;;  %v225_v48 = vsel %vm200_vm0, %v605_v43, 0.0  ;;  %v307_v15 = vor.u32 1.1754944e-38, %v306_v0  ;;  %vm320_vm0 = vcmp.eq.f32.partialorder %v319_v7, 8.507059e+37 }
  0x25   : > { %v518_v49 = vpop.eup %517  ;;  %v224_v50 = vadd.f32 %v223_v45, %v222_v44  ;;  %v266_v51 = vmul.f32 %v516_v47, %v261_v29  ;;  %vm271_vm5 = vweird.f32 %v516_v47  ;;  %v322_v24 = vor.u32 1.1754944e-38, %v321_v8 }
  0x26   : > { %v281_v54 = vmul.f32 %v518_v49, %v262_v30  ;;  %v520_v56 = vpop.eup %519  ;;  %vm286_vm6 = vweird.f32 %v518_v49  ;;  %vm620_vm9 = vmor %vm270_vm1, %vm271_vm5 }
  0x27   : > { %v226_v57 = vadd.f32 %v225_v48, %v224_v50  ;;  %v267_v58 = vsub.f32 1.0, %v266_v51  ;;  %v522_v60 = vpop.eup %521  ;;  %v296_v62 = vmul.f32 %v520_v56, %v263_v33  ;;  %vm301_vm8 = vweird.f32 %v520_v56  ;;  %vm626_vm10 = vmor %vm285_vm2, %vm286_vm6 }
  0x28   : > { %v282_v61 = vsub.f32 1.0, %v281_v54  ;;  %v311_v5 = vmul.f32 %v522_v60, %v594_v35  ;;  %vm316_vm12 = vweird.f32 %v522_v60  ;;  %vm639_vm13 = vmor %vm300_vm7, %vm301_vm8 }
  0x29   : > { %523 = vrcp.f32 %v226_v57  ;;  %v268_v1 = vmul.f32 %v516_v47, %v267_v58  ;;  %v297_v4 = vsub.f32 1.0, %v296_v62  ;;  %vm658_vm15 = vmor %vm315_vm11, %vm316_vm12  ;;  %vm232_vm1 = vweird.f32 %v226_v57 }
  0x2a   : > { %v283_v3 = vmul.f32 %v518_v49, %v282_v61  ;;  %v312_v12 = vsub.f32 1.0, %v311_v5  ;;  %v238_v28 = vand.u32 2147483648, %v226_v57  ;;  %v236_v31 = vand.u32 2147483647, %v226_v57 }
  0x2b   : > { %v269_v9 = vadd.f32 %v516_v47, %v268_v1  ;;  %v298_v11 = vmul.f32 %v520_v56, %v297_v4 }
  0x2c   : > { %v284_v10 = vadd.f32 %v518_v49, %v283_v3  ;;  %v313_v19 = vmul.f32 %v522_v60, %v312_v12  ;;  %v239_v37 = vor.u32 1.1754944e-38, %v238_v28 }
  0x2d   : > { %v273_v16 = vsel %vm620_vm9, %v516_v47, %v269_v9  ;;  %v299_v18 = vadd.f32 %v520_v56, %v298_v11 }
  0x2e   : > { %v288_v17 = vsel %vm626_vm10, %v518_v49, %v284_v10  ;;  %v278_v21 = vsel %vm611_vm3, %v277_v53, %v273_v16  ;;  %v314_v27 = vadd.f32 %v522_v60, %v313_v19 }
  0x2f   : > { %v524_v20 = vpop.eup %523  ;;  %v293_v22 = vsel %vm615_vm4, %v292_v59, %v288_v17  ;;  %325 = vst [vmem:[%s195_s19] sm:$0x3] %v278_v21  ;;  %v303_v26 = vsel %vm639_vm13, %v520_v56, %v299_v18  ;;  %vm237_vm4 = vcmp.eq.f32.partialorder %v236_v31, 8.507059e+37 }
  0x30   : > { %v228_v25 = vmul.f32 %v524_v20, %v226_v57  ;;  %326 = vst [vmem:[%s195_s19 + $0x2] sm:$0x3] %v293_v22  ;;  %v308_v29 = vsel %vm643_vm14, %v307_v15, %v303_v26  ;;  %vm233_vm2 = vweird.f32 %v524_v20  ;;  %v318_v32 = vsel %vm658_vm15, %v522_v60, %v314_v27 }
  0x31   : > { %327 = vst [vmem:[%s195_s19 + $0x4] sm:$0x3] %v308_v29  ;;  %v323_v33 = vsel %vm320_vm0, %v322_v24, %v318_v32  ;;  %vm234_vm3 = vmor %vm232_vm1, %vm233_vm2 }
  0x32   : > { %v229_v30 = vsub.f32 1.0, %v228_v25  ;;  %328 = vst [vmem:[%s195_s19 + $0x6] sm:$0x3] %v323_v33 }
  0x34   : > { %v230_v35 = vmul.f32 %v524_v20, %v229_v30 }
  0x36   : > { %v231_v38 = vadd.f32 %v524_v20, %v230_v35 }
  0x38   : > { %v235_v40 = vsel %vm234_vm3, %v524_v20, %v231_v38 }
  0x39   : > { %v240_v41 = vsel %vm237_vm4, %v239_v37, %v235_v40 }
  0x3a   : > { %v241_v42 = vmul.f32 %v592_v34, %v240_v41  ;;  %v242_v44 = vmul.f32 %v596_v36, %v240_v41  ;;  %v243_v45 = vmul.f32 %v600_v39, %v240_v41  ;;  %v244_v46 = vmul.f32 %v605_v43, %v240_v41 }
  0x3c   : > { %245 = vst [vmem:[%s187_s22] sm:$0x3] %v241_v42 }
  0x3d   : > { %246 = vst [vmem:[%s187_s22 + $0x2] sm:$0x3] %v242_v44 }
  0x3e   : > { %247 = vst [vmem:[%s187_s22 + $0x4] sm:$0x3] %v243_v45 }
  0x3f   : > { %248 = vst [vmem:[%s187_s22 + $0x6] sm:$0x3] %v244_v46 }
  0x40 PF: > { %s13_s11 = sadd.s32 1, %s547_s11   ;;  %s702_s9 = smov %s543_s10 }
  0x41   : > { %p10_p5 = scmp.ge.s32.totalorder %s13_s11, 4   ;;  %s703_s10 = smov %s705_s12 }
  0x43   :  { %12 = sbr.rel (!%p10_p5) target bundleno = 2 (0x2), region = 66 }

</bundles_post_ra>
